<compile_context>
chip_gen: v7x
topology: tpu7x:2x2x1
jax: 0.10.0
libtpu: 0.0.40
codegen_flags: <defaults>
</compile_context>

<pallas_src>
import functools

import jax
import jax.numpy as jnp
from jax.experimental import pallas as pl
from jax.experimental.pallas import tpu as pltpu


def _round_up(x, m):
    return ((x + m - 1) // m) * m


def _pick_row_block(num):
    # Cap the batch block at 8 rows (one f32 sublane tile): the (bn, 128)
    # in-register partials stay at 1 vreg each and more batch blocks feed the
    # "parallel" grid axis.  If num is not a multiple of 8 the block must span
    # the full batch dim (BlockSpec rule); fine for the small batches this
    # loss sees in practice.
    if num % 8 == 0:
        return 8
    return num


def _dice_kernel(pred_ref, targ_ref, inter_ref, s12_ref, inter_acc, s12_acc,
                 *, d, td, bn, num_tiles_d, mask_tail, unroll):
    """Accumulate per-sample sums over D tiles; finalize on the last k tile.

    pred_ref / targ_ref : (bn, td) VMEM tile of the flattened inputs
    inter_ref / s12_ref : (bn, 1) per-sample partial sums for this D chunk
    inter_acc / s12_acc : (bn, 128) f32 lane-wide accumulators (VMEM scratch)
    """
    c = pl.program_id(1)          # D-chunk axis ("parallel")
    k = pl.program_id(2)          # reduction axis inside the chunk (last)
    num_k = pl.num_programs(2)
    tile_idx = c * num_k + k      # global tile index along flattened D

    @pl.when(k == 0)
    def _():
        inter_acc[...] = jnp.zeros_like(inter_acc)
        s12_acc[...] = jnp.zeros_like(s12_acc)

    def accumulate(apply_mask):
        # Per-slice ref loads: the live set is a handful of vregs regardless
        # of td (never materialise the whole (bn, td) tile as a value).
        lane = (jax.lax.broadcasted_iota(jnp.int32, (bn, 128), 1)
                if apply_mask else None)

        def body(g, carry):
            part_i, part_s = carry
            start = pl.multiple_of(g * 128, 128)
            ps = pred_ref[:, pl.ds(start, 128)].astype(jnp.float32)
            ts = targ_ref[:, pl.ds(start, 128)].astype(jnp.float32)
            if apply_mask:
                # Pallas does not zero out-of-range block contents.
                col = tile_idx * td + start + lane
                keep = col < d
                ps = jnp.where(keep, ps, 0.0)
                ts = jnp.where(keep, ts, 0.0)
            return part_i + ps * ts, part_s + (ps + ts)

        zeros = jnp.zeros((bn, 128), jnp.float32)
        part_i, part_s = jax.lax.fori_loop(
            0, td // 128, body, (zeros, zeros), unroll=unroll)
        inter_acc[...] += part_i
        s12_acc[...] += part_s

    if mask_tail:
        # Only the globally-last tile can cross D: keep the mask off the
        # steady-state path.
        is_last = tile_idx == num_tiles_d - 1

        @pl.when(jnp.logical_not(is_last))
        def _():
            accumulate(False)

        @pl.when(is_last)
        def _():
            accumulate(True)
    else:
        accumulate(False)

    @pl.when(k == num_k - 1)
    def _():
        # Single cross-lane (XLU) reduce per (batch block, D chunk).
        inter_ref[...] = jnp.sum(inter_acc[...], axis=1, keepdims=True)
        s12_ref[...] = jnp.sum(s12_acc[...], axis=1, keepdims=True)


@functools.partial(jax.jit, static_argnames=("target_payload_bytes",))
def dice_loss(pred, target, target_payload_bytes=4 * 1024 * 1024):
    """score = 1 - mean_n( 2*sum(pred*target) / (sum(pred) + sum(target)) )."""
    num = pred.shape[0]
    m1 = pred.reshape(num, -1)
    m2 = target.reshape(num, -1)
    d = m1.shape[1]

    bn = _pick_row_block(num)
    num_b = num // bn

    # Tile width along the flattened dim: multiple of 128, sized so each grid
    # step streams ~target_payload_bytes across both inputs, capped by D and
    # by a VMEM budget that (with double-buffering of both inputs) stays well
    # inside v7x's 64 MiB physical VMEM (v5e/v6e have 128 MiB, same cap safe).
    td = max(128, target_payload_bytes // (2 * bn * 4))
    vmem_cap_td = max(128, (24 * 1024 * 1024) // (2 * 2 * bn * 4))
    td = min(td, vmem_cap_td)
    td = min(_round_up(td, 128), _round_up(d, 128))

    num_tiles_d = pl.cdiv(d, td)
    mask_tail = (d % td) != 0

    # If the batch axis alone cannot feed both v7x TensorCores, split the D
    # reduction into two "parallel" chunks (only when it splits evenly, so the
    # globally-last tile stays the only ragged one).
    if num_b == 1 and num_tiles_d >= 2 and num_tiles_d % 2 == 0:
        num_c = 2
    else:
        num_c = 1
    num_k = num_tiles_d // num_c

    unroll = min(8, max(1, td // 128))

    kernel = functools.partial(
        _dice_kernel, d=d, td=td, bn=bn, num_tiles_d=num_tiles_d,
        mask_tail=mask_tail, unroll=unroll)

    inter, s12 = pl.pallas_call(
        kernel,
        out_shape=(
            jax.ShapeDtypeStruct((num_c, num, 1), jnp.float32),
            jax.ShapeDtypeStruct((num_c, num, 1), jnp.float32),
        ),
        grid_spec=pltpu.PrefetchScalarGridSpec(
            num_scalar_prefetch=0,
            grid=(num_b, num_c, num_k),      # reduction (k) axis last
            in_specs=[
                pl.BlockSpec((bn, td), lambda b, c, k: (b, c * num_k + k)),
                pl.BlockSpec((bn, td), lambda b, c, k: (b, c * num_k + k)),
            ],
            out_specs=[
                pl.BlockSpec((None, bn, 1), lambda b, c, k: (c, b, 0)),
                pl.BlockSpec((None, bn, 1), lambda b, c, k: (c, b, 0)),
            ],
            scratch_shapes=[
                pltpu.VMEM((bn, 128), jnp.float32),
                pltpu.VMEM((bn, 128), jnp.float32),
            ],
        ),
        compiler_params=pltpu.CompilerParams(
            dimension_semantics=("parallel", "parallel", "arbitrary"),
            # <= 8 MiB of pipeline buffers for the default payload; 40 MiB
            # leaves headroom and stays under v7x's 64 MiB physical VMEM.
            vmem_limit_bytes=40 * 1024 * 1024,
        ),
    )(m1, m2)

    # Tiny epilogue in plain JAX: combine D-chunk partials, per-sample ratio,
    # then the scalar mean.  smooth = 0, matching the PyTorch module exactly.
    inter_n = jnp.sum(inter[..., 0], axis=0)
    s12_n = jnp.sum(s12[..., 0], axis=0)
    return 1.0 - jnp.sum(2.0 * inter_n / s12_n) / num


def _reference(pred, target):
    num = pred.shape[0]
    m1 = pred.reshape(num, -1).astype(jnp.float32)
    m2 = target.reshape(num, -1).astype(jnp.float32)
    inter = jnp.sum(m1 * m2, axis=1)
    return 1.0 - jnp.sum(2.0 * inter /
                         (jnp.sum(m1, axis=1) + jnp.sum(m2, axis=1))) / num


if __name__ == "__main__":
    key = jax.random.PRNGKey(0)
    k1, k2 = jax.random.split(key)

    # NCHW like the PyTorch module would see from a segmentation net.
    N, C, H, W = 2, 4, 16, 16
    pred = jax.nn.sigmoid(jax.random.normal(k1, (N, C, H, W), dtype=jnp.float32))
    target = (jax.random.uniform(k2, (N, C, H, W)) > 0.5).astype(jnp.float32)
    out = jax.block_until_ready(dice_loss(pred, target))
    ref = _reference(pred, target)
    assert jnp.allclose(out, ref, atol=1e-5, rtol=1e-4), (out, ref)

    # Ragged flattened dim (D = 390): in-kernel tail masking, single tile.
    k3, k4 = jax.random.split(k2)
    pred2 = jax.nn.sigmoid(jax.random.normal(k3, (2, 3, 10, 13), dtype=jnp.float32))
    target2 = (jax.random.uniform(k4, (2, 3, 10, 13)) > 0.5).astype(jnp.float32)
    out2 = jax.block_until_ready(dice_loss(pred2, target2))
    ref2 = _reference(pred2, target2)
    assert jnp.allclose(out2, ref2, atol=1e-5, rtol=1e-4), (out2, ref2)

    # Larger batch: bn = 8, 3 parallel batch blocks, ragged D.
    k5, k6 = jax.random.split(k4)
    pred3 = jax.nn.sigmoid(jax.random.normal(k5, (24, 3, 9, 11), dtype=jnp.float32))
    target3 = (jax.random.uniform(k6, (24, 3, 9, 11)) > 0.5).astype(jnp.float32)
    out3 = jax.block_until_ready(dice_loss(pred3, target3))
    ref3 = _reference(pred3, target3)
    assert jnp.allclose(out3, ref3, atol=1e-5, rtol=1e-4), (out3, ref3)

    # Small batch + multi-tile D (payload override): exercises the 2-way
    # parallel D split (grid (1, 2, 2)) and multi-k accumulation.
    k7, k8 = jax.random.split(k6)
    pred4 = jax.nn.sigmoid(jax.random.normal(k7, (2, 4, 64, 64), dtype=jnp.float32))
    target4 = (jax.random.uniform(k8, (2, 4, 64, 64)) > 0.5).astype(jnp.float32)
    out4 = jax.block_until_ready(
        dice_loss(pred4, target4, target_payload_bytes=64 * 1024))
    ref4 = _reference(pred4, target4)
    assert jnp.allclose(out4, ref4, atol=1e-5, rtol=1e-4), (out4, ref4)

    # Ragged D split across 2 parallel chunks (grid (1, 2, 1)): the mask runs
    # only on the globally-last tile.
    k9, k10 = jax.random.split(k8)
    pred5 = jax.nn.sigmoid(jax.random.normal(k9, (2, 3, 50, 37), dtype=jnp.float32))
    target5 = (jax.random.uniform(k10, (2, 3, 50, 37)) > 0.5).astype(jnp.float32)
    out5 = jax.block_until_ready(
        dice_loss(pred5, target5, target_payload_bytes=64 * 1024))
    ref5 = _reference(pred5, target5)
    assert jnp.allclose(out5, ref5, atol=1e-5, rtol=1e-4), (out5, ref5)

    print("KERNEL_OK")
</pallas_src>

<mosaic_0001>
module attributes {stable_mosaic.version = 11 : i64} {
  func.func @_dice_kernel(%arg0: i32, %arg1: i32, %arg2: i32, %arg3: memref<2x1024xf32, #tpu.memory_space<vmem>>, %arg4: memref<2x1024xf32, #tpu.memory_space<vmem>>, %arg5: memref<1x2x1xf32, #tpu.memory_space<vmem>>, %arg6: memref<1x2x1xf32, #tpu.memory_space<vmem>>, %arg7: memref<2x128xf32, #tpu.memory_space<vmem>>, %arg8: memref<2x128xf32, #tpu.memory_space<vmem>>) attributes {dimension_semantics = [#tpu.dimension_semantics<parallel>, #tpu.dimension_semantics<parallel>, #tpu.dimension_semantics<arbitrary>], iteration_bounds = array<i64: 1, 1, 1>, scalar_prefetch = 0 : i64, scratch_operands = 2 : i64, tpu.core_type = #tpu.core_type<tc>, window_params = [{transform_indices = @transform_0, window_bounds = array<i64: 2, 1024>}, {transform_indices = @transform_1, window_bounds = array<i64: 2, 1024>}, {transform_indices = @transform_2, window_bounds = array<i64: 1, 2, 1>}, {transform_indices = @transform_3, window_bounds = array<i64: 1, 2, 1>}]} {
    %c0_i32 = arith.constant 0 : i32
    %0 = arith.cmpi eq, %arg2, %c0_i32 : i32
    %1 = arith.extui %0 : i1 to i32
    %c0_i32_0 = arith.constant 0 : i32
    %2 = arith.cmpi ne, %1, %c0_i32_0 : i32
    scf.if %2 {
      %cst_34 = arith.constant 0.000000e+00 : f32
      %93 = vector.broadcast %cst_34 : f32 to vector<2x128xf32>
      %c0_35 = arith.constant 0 : index
      %c0_36 = arith.constant 0 : index
      %94 = vector.load %arg7[%c0_35, %c0_36] : memref<2x128xf32, #tpu.memory_space<vmem>>, vector<2x128xf32>
      tpu.vector_store %arg7[%c0_35, %c0_36], %93 {strides = array<i32>} : memref<2x128xf32, #tpu.memory_space<vmem>>, vector<2x128xf32>,
      %cst_37 = arith.constant 0.000000e+00 : f32
      %95 = vector.broadcast %cst_37 : f32 to vector<2x128xf32>
      %c0_38 = arith.constant 0 : index
      %c0_39 = arith.constant 0 : index
      %96 = vector.load %arg8[%c0_38, %c0_39] : memref<2x128xf32, #tpu.memory_space<vmem>>, vector<2x128xf32>
      tpu.vector_store %arg8[%c0_38, %c0_39], %95 {strides = array<i32>} : memref<2x128xf32, #tpu.memory_space<vmem>>, vector<2x128xf32>,
    } else {
    }
    %cst = arith.constant 0.000000e+00 : f32
    %3 = vector.broadcast %cst : f32 to vector<2x128xf32>
    %c0_i32_1 = arith.constant 0 : i32
    %c128_i32 = arith.constant 128 : i32
    %4 = arith.muli %c0_i32_1, %c128_i32 : i32
    %5 = tpu.assume_multiple %4, 128 : i32
    %c0 = arith.constant 0 : index
    %6 = arith.index_cast %5 : i32 to index
    %7 = vector.load %arg3[%c0, %6] : memref<2x1024xf32, #tpu.memory_space<vmem>>, vector<2x128xf32>
    %c0_2 = arith.constant 0 : index
    %8 = arith.index_cast %5 : i32 to index
    %9 = vector.load %arg4[%c0_2, %8] : memref<2x1024xf32, #tpu.memory_space<vmem>>, vector<2x128xf32>
    %10 = arith.mulf %7, %9 : vector<2x128xf32>
    %11 = arith.addf %3, %10 : vector<2x128xf32>
    %12 = arith.addf %7, %9 : vector<2x128xf32>
    %13 = arith.addf %3, %12 : vector<2x128xf32>
    %c1_i32 = arith.constant 1 : i32
    %c128_i32_3 = arith.constant 128 : i32
    %14 = arith.muli %c1_i32, %c128_i32_3 : i32
    %15 = tpu.assume_multiple %14, 128 : i32
    %c0_4 = arith.constant 0 : index
    %16 = arith.index_cast %15 : i32 to index
    %17 = vector.load %arg3[%c0_4, %16] : memref<2x1024xf32, #tpu.memory_space<vmem>>, vector<2x128xf32>
    %c0_5 = arith.constant 0 : index
    %18 = arith.index_cast %15 : i32 to index
    %19 = vector.load %arg4[%c0_5, %18] : memref<2x1024xf32, #tpu.memory_space<vmem>>, vector<2x128xf32>
    %20 = arith.mulf %17, %19 : vector<2x128xf32>
    %21 = arith.addf %11, %20 : vector<2x128xf32>
    %22 = arith.addf %17, %19 : vector<2x128xf32>
    %23 = arith.addf %13, %22 : vector<2x128xf32>
    %c2_i32 = arith.constant 2 : i32
    %c128_i32_6 = arith.constant 128 : i32
    %24 = arith.muli %c2_i32, %c128_i32_6 : i32
    %25 = tpu.assume_multiple %24, 128 : i32
    %c0_7 = arith.constant 0 : index
    %26 = arith.index_cast %25 : i32 to index
    %27 = vector.load %arg3[%c0_7, %26] : memref<2x1024xf32, #tpu.memory_space<vmem>>, vector<2x128xf32>
    %c0_8 = arith.constant 0 : index
    %28 = arith.index_cast %25 : i32 to index
    %29 = vector.load %arg4[%c0_8, %28] : memref<2x1024xf32, #tpu.memory_space<vmem>>, vector<2x128xf32>
    %30 = arith.mulf %27, %29 : vector<2x128xf32>
    %31 = arith.addf %21, %30 : vector<2x128xf32>
    %32 = arith.addf %27, %29 : vector<2x128xf32>
    %33 = arith.addf %23, %32 : vector<2x128xf32>
    %c3_i32 = arith.constant 3 : i32
    %c128_i32_9 = arith.constant 128 : i32
    %34 = arith.muli %c3_i32, %c128_i32_9 : i32
    %35 = tpu.assume_multiple %34, 128 : i32
    %c0_10 = arith.constant 0 : index
    %36 = arith.index_cast %35 : i32 to index
    %37 = vector.load %arg3[%c0_10, %36] : memref<2x1024xf32, #tpu.memory_space<vmem>>, vector<2x128xf32>
    %c0_11 = arith.constant 0 : index
    %38 = arith.index_cast %35 : i32 to index
    %39 = vector.load %arg4[%c0_11, %38] : memref<2x1024xf32, #tpu.memory_space<vmem>>, vector<2x128xf32>
    %40 = arith.mulf %37, %39 : vector<2x128xf32>
    %41 = arith.addf %31, %40 : vector<2x128xf32>
    %42 = arith.addf %37, %39 : vector<2x128xf32>
    %43 = arith.addf %33, %42 : vector<2x128xf32>
    %c4_i32 = arith.constant 4 : i32
    %c128_i32_12 = arith.constant 128 : i32
    %44 = arith.muli %c4_i32, %c128_i32_12 : i32
    %45 = tpu.assume_multiple %44, 128 : i32
    %c0_13 = arith.constant 0 : index
    %46 = arith.index_cast %45 : i32 to index
    %47 = vector.load %arg3[%c0_13, %46] : memref<2x1024xf32, #tpu.memory_space<vmem>>, vector<2x128xf32>
    %c0_14 = arith.constant 0 : index
    %48 = arith.index_cast %45 : i32 to index
    %49 = vector.load %arg4[%c0_14, %48] : memref<2x1024xf32, #tpu.memory_space<vmem>>, vector<2x128xf32>
    %50 = arith.mulf %47, %49 : vector<2x128xf32>
    %51 = arith.addf %41, %50 : vector<2x128xf32>
    %52 = arith.addf %47, %49 : vector<2x128xf32>
    %53 = arith.addf %43, %52 : vector<2x128xf32>
    %c5_i32 = arith.constant 5 : i32
    %c128_i32_15 = arith.constant 128 : i32
    %54 = arith.muli %c5_i32, %c128_i32_15 : i32
    %55 = tpu.assume_multiple %54, 128 : i32
    %c0_16 = arith.constant 0 : index
    %56 = arith.index_cast %55 : i32 to index
    %57 = vector.load %arg3[%c0_16, %56] : memref<2x1024xf32, #tpu.memory_space<vmem>>, vector<2x128xf32>
    %c0_17 = arith.constant 0 : index
    %58 = arith.index_cast %55 : i32 to index
    %59 = vector.load %arg4[%c0_17, %58] : memref<2x1024xf32, #tpu.memory_space<vmem>>, vector<2x128xf32>
    %60 = arith.mulf %57, %59 : vector<2x128xf32>
    %61 = arith.addf %51, %60 : vector<2x128xf32>
    %62 = arith.addf %57, %59 : vector<2x128xf32>
    %63 = arith.addf %53, %62 : vector<2x128xf32>
    %c6_i32 = arith.constant 6 : i32
    %c128_i32_18 = arith.constant 128 : i32
    %64 = arith.muli %c6_i32, %c128_i32_18 : i32
    %65 = tpu.assume_multiple %64, 128 : i32
    %c0_19 = arith.constant 0 : index
    %66 = arith.index_cast %65 : i32 to index
    %67 = vector.load %arg3[%c0_19, %66] : memref<2x1024xf32, #tpu.memory_space<vmem>>, vector<2x128xf32>
    %c0_20 = arith.constant 0 : index
    %68 = arith.index_cast %65 : i32 to index
    %69 = vector.load %arg4[%c0_20, %68] : memref<2x1024xf32, #tpu.memory_space<vmem>>, vector<2x128xf32>
    %70 = arith.mulf %67, %69 : vector<2x128xf32>
    %71 = arith.addf %61, %70 : vector<2x128xf32>
    %72 = arith.addf %67, %69 : vector<2x128xf32>
    %73 = arith.addf %63, %72 : vector<2x128xf32>
    %c7_i32 = arith.constant 7 : i32
    %c128_i32_21 = arith.constant 128 : i32
    %74 = arith.muli %c7_i32, %c128_i32_21 : i32
    %75 = tpu.assume_multiple %74, 128 : i32
    %c0_22 = arith.constant 0 : index
    %76 = arith.index_cast %75 : i32 to index
    %77 = vector.load %arg3[%c0_22, %76] : memref<2x1024xf32, #tpu.memory_space<vmem>>, vector<2x128xf32>
    %c0_23 = arith.constant 0 : index
    %78 = arith.index_cast %75 : i32 to index
    %79 = vector.load %arg4[%c0_23, %78] : memref<2x1024xf32, #tpu.memory_space<vmem>>, vector<2x128xf32>
    %80 = arith.mulf %77, %79 : vector<2x128xf32>
    %81 = arith.addf %71, %80 : vector<2x128xf32>
    %82 = arith.addf %77, %79 : vector<2x128xf32>
    %83 = arith.addf %73, %82 : vector<2x128xf32>
    %c8_i32 = arith.constant 8 : i32
    %c0_24 = arith.constant 0 : index
    %c0_25 = arith.constant 0 : index
    %84 = vector.load %arg7[%c0_24, %c0_25] : memref<2x128xf32, #tpu.memory_space<vmem>>, vector<2x128xf32>
    %85 = arith.addf %84, %81 : vector<2x128xf32>
    %c0_26 = arith.constant 0 : index
    %c0_27 = arith.constant 0 : index
    %86 = vector.load %arg7[%c0_26, %c0_27] : memref<2x128xf32, #tpu.memory_space<vmem>>, vector<2x128xf32>
    tpu.vector_store %arg7[%c0_26, %c0_27], %85 {strides = array<i32>} : memref<2x128xf32, #tpu.memory_space<vmem>>, vector<2x128xf32>,
    %c0_28 = arith.constant 0 : index
    %c0_29 = arith.constant 0 : index
    %87 = vector.load %arg8[%c0_28, %c0_29] : memref<2x128xf32, #tpu.memory_space<vmem>>, vector<2x128xf32>
    %88 = arith.addf %87, %83 : vector<2x128xf32>
    %c0_30 = arith.constant 0 : index
    %c0_31 = arith.constant 0 : index
    %89 = vector.load %arg8[%c0_30, %c0_31] : memref<2x128xf32, #tpu.memory_space<vmem>>, vector<2x128xf32>
    tpu.vector_store %arg8[%c0_30, %c0_31], %88 {strides = array<i32>} : memref<2x128xf32, #tpu.memory_space<vmem>>, vector<2x128xf32>,
    %c0_i32_32 = arith.constant 0 : i32
    %90 = arith.cmpi eq, %arg2, %c0_i32_32 : i32
    %91 = arith.extui %90 : i1 to i32
    %c0_i32_33 = arith.constant 0 : i32
    %92 = arith.cmpi ne, %91, %c0_i32_33 : i32
    scf.if %92 {
      %c0_34 = arith.constant 0 : index
      %c0_35 = arith.constant 0 : index
      %93 = vector.load %arg7[%c0_34, %c0_35] : memref<2x128xf32, #tpu.memory_space<vmem>>, vector<2x128xf32>
      %cst_36 = arith.constant dense<0.000000e+00> : vector<2xf32>
      %94 = vector.multi_reduction <add>, %93, %cst_36 [1] : vector<2x128xf32> to vector<2xf32>
      %95 = vector.shape_cast %94 : vector<2xf32> to vector<2x1xf32>
      %c0_37 = arith.constant 0 : index
      %c0_38 = arith.constant 0 : index
      %c0_39 = arith.constant 0 : index
      %96 = vector.load %arg5[%c0_37, %c0_38, %c0_39] : memref<1x2x1xf32, #tpu.memory_space<vmem>>, vector<1x2x1xf32>
      %97 = vector.shape_cast %96 : vector<1x2x1xf32> to vector<2x1xf32>
      %98 = vector.shape_cast %95 : vector<2x1xf32> to vector<1x2x1xf32>
      tpu.vector_store %arg5[%c0_37, %c0_38, %c0_39], %98 {strides = array<i32>} : memref<1x2x1xf32, #tpu.memory_space<vmem>>, vector<1x2x1xf32>,
      %c0_40 = arith.constant 0 : index
      %c0_41 = arith.constant 0 : index
      %99 = vector.load %arg8[%c0_40, %c0_41] : memref<2x128xf32, #tpu.memory_space<vmem>>, vector<2x128xf32>
      %cst_42 = arith.constant dense<0.000000e+00> : vector<2xf32>
      %100 = vector.multi_reduction <add>, %99, %cst_42 [1] : vector<2x128xf32> to vector<2xf32>
      %101 = vector.shape_cast %100 : vector<2xf32> to vector<2x1xf32>
      %c0_43 = arith.constant 0 : index
      %c0_44 = arith.constant 0 : index
      %c0_45 = arith.constant 0 : index
      %102 = vector.load %arg6[%c0_43, %c0_44, %c0_45] : memref<1x2x1xf32, #tpu.memory_space<vmem>>, vector<1x2x1xf32>
      %103 = vector.shape_cast %102 : vector<1x2x1xf32> to vector<2x1xf32>
      %104 = vector.shape_cast %101 : vector<2x1xf32> to vector<1x2x1xf32>
      tpu.vector_store %arg6[%c0_43, %c0_44, %c0_45], %104 {strides = array<i32>} : memref<1x2x1xf32, #tpu.memory_space<vmem>>, vector<1x2x1xf32>,
    } else {
    }
    return
  }
  func.func @transform_0(%arg0: i32, %arg1: i32, %arg2: i32) -> (i32, i32) {
    %c1_i32 = arith.constant 1 : i32
    %0 = arith.muli %arg1, %c1_i32 : i32
    %1 = arith.addi %0, %arg2 : i32
    %c0_i32 = arith.constant 0 : i32
    return %arg0, %1 : i32, i32
  }
  func.func @transform_1(%arg0: i32, %arg1: i32, %arg2: i32) -> (i32, i32) {
    %c1_i32 = arith.constant 1 : i32
    %0 = arith.muli %arg1, %c1_i32 : i32
    %1 = arith.addi %0, %arg2 : i32
    %c0_i32 = arith.constant 0 : i32
    return %arg0, %1 : i32, i32
  }
  func.func @transform_2(%arg0: i32, %arg1: i32, %arg2: i32) -> (i32, i32, i32) {
    %c0_i32 = arith.constant 0 : i32
    %c0_i32_0 = arith.constant 0 : i32
    return %arg1, %arg0, %c0_i32 : i32, i32, i32
  }
  func.func @transform_3(%arg0: i32, %arg1: i32, %arg2: i32) -> (i32, i32, i32) {
    %c0_i32 = arith.constant 0 : i32
    %c0_i32_0 = arith.constant 0 : i32
    return %arg1, %arg0, %c0_i32 : i32, i32, i32
  }
}

</mosaic_0001>

<bundles_post_ra>
// kernel: dice_loss.1
= control target key start
LH: loop header
LB: loop body
LE: loop exit
PB: predicated region body
PF: predicated region fallthrough
CT: control target
= control target key end

     0   :  { %v181_v0 = vmov 0.0   ;;  %vm135_vm0 = vcmask 1041408   ;;  %vm139_vm1 = vcmask 1024   ;;  %s256_s0 = inlined_call_operand.vmem [shape: f32[2,1024], index: 0, kind: input, shape index: {}]   ;;  %s257_s1 = inlined_call_operand.vmem [shape: f32[2,1024], index: 1, kind: input, shape index: {}]   ;;  %s258_s2 = inlined_call_operand.vmem [shape: f32[1,2,1], index: 2, kind: output, shape index: {0}]   ;;  %s259_s3 = inlined_call_operand.vmem [shape: f32[1,2,1], index: 3, kind: output, shape index: {1}]  }
   0x1   :  { %61 = vst [vmem:[#allocation2] sm:$0x3] %v181_v0  ;;  %v63_v1 = vld [vmem:[%s256_s0] sm:$0x3]  ;;  %v166_v3 = vld [vmem:[%s256_s0 + $0x2] sm:$0x3] }
   0x2   :  { %v64_v2 = vld [vmem:[%s257_s1] sm:$0x3]  ;;  %62 = vst [vmem:[#allocation3] sm:$0x3] %v181_v0  ;;  %v167_v5 = vld [vmem:[%s257_s1 + $0x2] sm:$0x3] }
   0x3   :  { %v65_v4 = vmul.f32 %v64_v2, %v63_v1  ;;  %v168_v6 = vld [vmem:[%s256_s0 + $0x4] sm:$0x3]  ;;  %v67_v8 = vadd.f32 %v64_v2, %v63_v1  ;;  %v73_v9 = vmul.f32 %v167_v5, %v166_v3  ;;  %v170_v11 = vld [vmem:[%s256_s0 + $0x6] sm:$0x3]  ;;  %v75_v13 = vadd.f32 %v167_v5, %v166_v3  ;;  %v172_v15 = vld [vmem:[%s256_s0 + $0x8] sm:$0x3] }
   0x4   :  { %v169_v7 = vld [vmem:[%s257_s1 + $0x4] sm:$0x3]  ;;  %v171_v12 = vld [vmem:[%s257_s1 + $0x6] sm:$0x3]  ;;  %v173_v16 = vld [vmem:[%s257_s1 + $0x8] sm:$0x3] }
   0x5   :  { %v81_v10 = vmul.f32 %v169_v7, %v168_v6  ;;  %v83_v14 = vadd.f32 %v169_v7, %v168_v6  ;;  %v74_v17 = vadd.f32 %v73_v9, %v65_v4  ;;  %v89_v18 = vmul.f32 %v171_v12, %v170_v11  ;;  %v174_v21 = vld [vmem:[%s256_s0 + $0xa] sm:$0x3]  ;;  %v176_v27 = vld [vmem:[%s256_s0 + $0xc] sm:$0x3]  ;;  %v178_v33 = vld [vmem:[%s256_s0 + $0xe] sm:$0x3] }
   0x6   :  { %v76_v19 = vadd.f32 %v75_v13, %v67_v8  ;;  %v91_v20 = vadd.f32 %v171_v12, %v170_v11  ;;  %v175_v22 = vld [vmem:[%s257_s1 + $0xa] sm:$0x3]  ;;  %v97_v24 = vmul.f32 %v173_v16, %v172_v15  ;;  %v99_v26 = vadd.f32 %v173_v16, %v172_v15  ;;  %v177_v28 = vld [vmem:[%s257_s1 + $0xc] sm:$0x3]  ;;  %v179_v34 = vld [vmem:[%s257_s1 + $0xe] sm:$0x3] }
   0x7   :  { %v82_v23 = vadd.f32 %v81_v10, %v74_v17  ;;  %v105_v30 = vmul.f32 %v175_v22, %v174_v21  ;;  %v107_v32 = vadd.f32 %v175_v22, %v174_v21  ;;  %v113_v36 = vmul.f32 %v177_v28, %v176_v27 }
   0x8   :  { %v84_v25 = vadd.f32 %v83_v14, %v76_v19  ;;  %v115_v38 = vadd.f32 %v177_v28, %v176_v27  ;;  %v121_v40 = vmul.f32 %v179_v34, %v178_v33  ;;  %v123_v42 = vadd.f32 %v179_v34, %v178_v33  ;;  %v125_v45 = vld [vmem:[#allocation2] sm:$0x3] }
   0x9   :  { %v90_v29 = vadd.f32 %v89_v18, %v82_v23  ;;  %v128_v46 = vld [vmem:[#allocation3] sm:$0x3] }
   0xa   :  { %v92_v31 = vadd.f32 %v91_v20, %v84_v25 }
   0xb   :  { %v98_v35 = vadd.f32 %v97_v24, %v90_v29 }
   0xc   :  { %v100_v37 = vadd.f32 %v99_v26, %v92_v31 }
   0xd   :  { %v106_v39 = vadd.f32 %v105_v30, %v98_v35 }
   0xe   :  { %v108_v41 = vadd.f32 %v107_v32, %v100_v37 }
   0xf   :  { %v114_v43 = vadd.f32 %v113_v36, %v106_v39 }
  0x10   :  { %v116_v44 = vadd.f32 %v115_v38, %v108_v41 }
  0x11   :  { %v122_v47 = vadd.f32 %v121_v40, %v114_v43 }
  0x12   :  { %v124_v48 = vadd.f32 %v123_v42, %v116_v44 }
  0x13   :  { %v126_v49 = vadd.f32 %v125_v45, %v122_v47 }
  0x14   :  { %v129_v50 = vadd.f32 %v128_v46, %v124_v48 }
  0x15   :  { %127 = vst [vmem:[#allocation2] sm:$0x3] %v126_v49 }
  0x16   :  { %130 = vst [vmem:[#allocation3] sm:$0x3] %v129_v50 }
  0x1c   :  { %v134_v51 = vld [vmem:[#allocation2] sm:$0x3] }
  0x1d   :  { %v141_v52 = vld [vmem:[#allocation3] sm:$0x3]  ;;  %v136_v53 = vsel %vm135_vm0, %v134_v51, 0.0 }
  0x1e   :  { %137 = vadd.xlane.f32.xlu0 %v136_v53  ;;  %v142_v54 = vsel %vm135_vm0, %v141_v52, 0.0 }
  0x22   :  { %143 = vadd.xlane.f32.xlu0 %v142_v54 }
  0xab   :  { %v138_v55 = vpop.xlane.xlu0 %137 }
  0xac   :  { %140 = vst.msk [vmem:[%s258_s2] sm:$0x3] %vm139_vm1, %v138_v55 }
  0xaf   :  { %v144_v56 = vpop.xlane.xlu0 %143 }
  0xb0   :  { %145 = vst.msk [vmem:[%s259_s3] sm:$0x3] %vm139_vm1, %v144_v56 }

</bundles_post_ra>
